<compile_context>
chip_gen: v6e
topology: v6e:2x2x1
jax: 0.10.0
libtpu: 0.0.40
codegen_flags: <defaults>
</compile_context>

<pallas_src>
import jax
import jax.numpy as jnp
from jax.experimental import pallas as pl
from jax.experimental.pallas import tpu as pltpu


def _round_up(x, m):
    return ((x + m - 1) // m) * m


def _cdiv(a, b):
    return (a + b - 1) // b


def _vmem_capacity_bytes():
    """Physical VMEM per TensorCore; falls back to the smallest current gen."""
    try:
        return int(pltpu.get_tpu_info().vmem_capacity_bytes)
    except Exception:
        return 64 * 2**20  # v7x per-TC value; most conservative of v5e/v6e/v7x


def _choose_tiles(M, N, K, itemsize, vmem_budget):
    """Pick (tm, tn, tk): large 256-aligned output tiles, budget-clamped."""
    sublane = {4: 8, 2: 16, 1: 32}.get(itemsize, 8)
    Mp = _round_up(M, sublane)
    Np = _round_up(N, 128)
    Kp = _round_up(K, 128)

    # Big output tiles push arithmetic intensity (~2*tm*tn/((tm+tn)*itemsize))
    # past the compute/memory crossover on v6e/v7x; 256-aligned for the 2x256
    # MXU.  Small-batch regime: the kernel is pure weight streaming, so
    # maximize the (tk, tn) weight block per grid step instead.
    tm, tn, tk = 512, 1024, 512
    if Mp <= 64:
        tn, tk = 2048, 1024

    tm = min(tm, Mp)
    tn = min(tn, Np)
    tk = min(tk, Kp)

    def usage(tm_, tn_, tk_):
        # double-buffered x / wT / bias / out blocks + K-resident f32 acc
        return (2 * (tm_ * tk_ + tk_ * tn_ + tn_ + tm_ * tn_) * itemsize
                + tm_ * tn_ * 4)

    # Shrink (largest axis first) until the double-buffered working set fits
    # the per-generation VMEM budget (64 MiB physical on v7x, 128 on v5e/v6e).
    while usage(tm, tn, tk) > vmem_budget:
        if tn >= max(tk, 256):
            tn = _round_up(tn // 2, 128)
        elif tk >= 256:
            tk = _round_up(tk // 2, 128)
        elif tm > sublane:
            tm = max(sublane, _round_up(tm // 2, sublane))
        else:
            break

    # Dual-TC (v7x) friendliness: keep >= 2 blocks on the parallel grid axes
    # when the problem is large enough to split along N.
    if _cdiv(Mp, tm) * _cdiv(Np, tn) == 1 and tn >= 256:
        tn = _round_up(tn // 2, 128)

    return tm, tn, tk


def prepare_linear_params(weight, bias, tn, tk, compute_dtype):
    """One-time parameter prep (hoist out of the hot path in a real model):
    transpose weight to the MXU-native (K, N) layout, zero-pad to tile
    multiples, and lift the bias to a padded f32 row."""
    N, K = weight.shape
    Np = _round_up(N, tn)
    Kp = _round_up(K, tk)
    wT = jnp.transpose(weight).astype(compute_dtype)  # (K, N)
    if (Kp, Np) != (K, N):
        wT = jnp.pad(wT, ((0, Kp - K), (0, Np - N)))
    b = bias.astype(jnp.float32)
    if Np != N:
        b = jnp.pad(b, (0, Np - N))
    return wT, b.reshape(1, Np)


def _linear_kernel(x_ref, w_ref, b_ref, o_ref, acc_ref):
    k = pl.program_id(2)
    nk = pl.num_programs(2)

    # (tm, tk) @ (tk, tn) -> (tm, tn), f32 accumulation on the MXU.
    partial = jnp.dot(x_ref[...], w_ref[...], preferred_element_type=jnp.float32)

    # First K step writes the partial product directly (no zero-init pass).
    @pl.when(k == 0)
    def _():
        acc_ref[...] = partial

    @pl.when(k > 0)
    def _():
        acc_ref[...] += partial

    @pl.when(k == nk - 1)
    def _():
        o_ref[...] = (acc_ref[...] + b_ref[...]).astype(o_ref.dtype)


def linear_pallas(x, weight, bias, *, use_bf16_mxu=False):
    """Forward of the PyTorch Linear module: y = x @ weight.T + bias.

    use_bf16_mxu: opt-in cast of f32 operands to bf16 for the MXU (accumulation
    and bias add stay in f32) — faster on v6e/v7x when numerics allow.
    """
    M, K = x.shape
    N, Kw = weight.shape
    assert K == Kw, "weight in_features mismatch"
    assert bias.shape == (N,), "bias shape mismatch"
    out_dtype = x.dtype

    compute_dtype = jnp.bfloat16 if use_bf16_mxu else x.dtype
    itemsize = jnp.dtype(compute_dtype).itemsize

    vmem_cap = _vmem_capacity_bytes()
    vmem_limit = min(vmem_cap * 3 // 4, 112 * 2**20)
    tm, tn, tk = _choose_tiles(M, N, K, itemsize, vmem_limit - 6 * 2**20)

    Mp = _round_up(M, tm)
    Np = _round_up(N, tn)
    Kp = _round_up(K, tk)

    # x: only pad when needed; padded K contributes 0 to the contraction,
    # padded M rows are sliced off after the call.
    xp = x.astype(compute_dtype)
    if (Mp, Kp) != (M, K):
        xp = jnp.pad(xp, ((0, Mp - M), (0, Kp - K)))

    # Static parameters: transpose + pad once (see docstring re: hoisting).
    wp, bp = prepare_linear_params(weight, bias, tn, tk, compute_dtype)

    grid = (Mp // tm, Np // tn, Kp // tk)
    grid_m, grid_n, grid_k = grid

    flops = 2 * Mp * Np * Kp
    # Account for re-streaming: x is re-read per N block, W per M block.
    bytes_accessed = (xp.size * xp.dtype.itemsize * grid_n
                      + wp.size * wp.dtype.itemsize * grid_m
                      + bp.size * bp.dtype.itemsize * grid_m
                      + Mp * Np * jnp.dtype(out_dtype).itemsize)

    out = pl.pallas_call(
        _linear_kernel,
        out_shape=jax.ShapeDtypeStruct((Mp, Np), out_dtype),
        grid_spec=pltpu.PrefetchScalarGridSpec(
            num_scalar_prefetch=0,
            grid=grid,
            in_specs=[
                pl.BlockSpec((tm, tk), lambda i, j, k: (i, k)),   # x tile
                pl.BlockSpec((tk, tn), lambda i, j, k: (k, j)),   # weight.T tile
                pl.BlockSpec((1, tn), lambda i, j, k: (0, j)),    # bias tile (f32)
            ],
            out_specs=pl.BlockSpec((tm, tn), lambda i, j, k: (i, j)),
            scratch_shapes=[pltpu.VMEM((tm, tn), jnp.float32)],
        ),
        compiler_params=pltpu.CompilerParams(
            dimension_semantics=("parallel", "parallel", "arbitrary"),
            vmem_limit_bytes=int(vmem_limit),
        ),
        cost_estimate=pl.CostEstimate(
            flops=int(flops), transcendentals=0,
            bytes_accessed=int(bytes_accessed)),
    )(xp, wp, bp)

    if Mp != M or Np != N:
        out = out[:M, :N]
    return out


# TODO(synk): only the forward pass of LinearFunction is implemented; the
# custom backward (g_input/g_weight/g_bias) is not part of this kernel.


if __name__ == "__main__":
    key = jax.random.PRNGKey(0)

    def run_case(batch, in_features, out_features, atol, rtol):
        kx, kw, kb = jax.random.split(jax.random.fold_in(key, in_features), 3)
        # Match the PyTorch module's init scheme: uniform in +/- 1/sqrt(in_features).
        bound = 1.0 / (in_features ** 0.5)
        x = jax.random.normal(kx, (batch, in_features), dtype=jnp.float32)
        weight = jax.random.uniform(kw, (out_features, in_features),
                                    dtype=jnp.float32, minval=-bound, maxval=bound)
        bias = jax.random.uniform(kb, (out_features,), dtype=jnp.float32,
                                  minval=-bound, maxval=bound)

        y = jax.block_until_ready(linear_pallas(x, weight, bias))

        # Reference semantics of LinearFunction.forward: input @ weight.T + bias
        ref = jnp.dot(x, weight.T,
                      precision=jax.lax.Precision.HIGHEST) + bias[None, :]
        assert y.shape == (batch, out_features) and y.dtype == x.dtype
        assert jnp.allclose(y, ref, atol=atol, rtol=rtol), \
            f"mismatch vs reference Linear ({batch},{in_features},{out_features})"

    # Small shape consistent with the module spec (batch, in_features, out_features).
    run_case(16, 32, 64, atol=1e-5, rtol=1e-5)
    # Non-tile-divisible shape to exercise the padding / slicing path.
    run_case(10, 300, 200, atol=1e-4, rtol=1e-4)

    print("KERNEL_OK")
</pallas_src>

<mosaic_0001>
module attributes {stable_mosaic.version = 11 : i64} {
  func.func @_linear_kernel(%arg0: i32, %arg1: i32, %arg2: i32, %arg3: memref<16x128xf32, #tpu.memory_space<vmem>>, %arg4: memref<128x128xf32, #tpu.memory_space<vmem>>, %arg5: memref<1x128xf32, #tpu.memory_space<vmem>>, %arg6: memref<16x128xf32, #tpu.memory_space<vmem>>, %arg7: memref<16x128xf32, #tpu.memory_space<vmem>>) attributes {dimension_semantics = [#tpu.dimension_semantics<parallel>, #tpu.dimension_semantics<parallel>, #tpu.dimension_semantics<arbitrary>], iteration_bounds = array<i64: 1, 1, 1>, scalar_prefetch = 0 : i64, scratch_operands = 1 : i64, tpu.core_type = #tpu.core_type<tc>, window_params = [{transform_indices = @transform_0, window_bounds = array<i64: 16, 128>}, {transform_indices = @transform_1, window_bounds = array<i64: 128, 128>}, {transform_indices = @transform_2, window_bounds = array<i64: 1, 128>}, {transform_indices = @transform_3, window_bounds = array<i64: 16, 128>}]} {
    %c0 = arith.constant 0 : index
    %c0_0 = arith.constant 0 : index
    %0 = vector.load %arg3[%c0, %c0_0] : memref<16x128xf32, #tpu.memory_space<vmem>>, vector<16x128xf32>
    %c0_1 = arith.constant 0 : index
    %c0_2 = arith.constant 0 : index
    %1 = vector.load %arg4[%c0_1, %c0_2] : memref<128x128xf32, #tpu.memory_space<vmem>>, vector<128x128xf32>
    %cst = arith.constant dense<0.000000e+00> : vector<16x128xf32>
    %2 = tpu.matmul %0, %1, %cst {dimension_numbers = #tpu.dot_dimension_numbers<[1], [0], [0], [1], [0, 0, 1, 1], [], []>} : vector<16x128xf32>, vector<128x128xf32>, vector<16x128xf32> -> vector<16x128xf32>
    %c0_i32 = arith.constant 0 : i32
    %3 = arith.cmpi eq, %arg2, %c0_i32 : i32
    %4 = arith.extui %3 : i1 to i32
    %c0_i32_3 = arith.constant 0 : i32
    %5 = arith.cmpi ne, %4, %c0_i32_3 : i32
    scf.if %5 {
      %c0_8 = arith.constant 0 : index
      %c0_9 = arith.constant 0 : index
      %12 = vector.load %arg7[%c0_8, %c0_9] : memref<16x128xf32, #tpu.memory_space<vmem>>, vector<16x128xf32>
      tpu.vector_store %arg7[%c0_8, %c0_9], %2 {strides = array<i32>} : memref<16x128xf32, #tpu.memory_space<vmem>>, vector<16x128xf32>,
    } else {
    }
    %c0_i32_4 = arith.constant 0 : i32
    %6 = arith.cmpi sgt, %arg2, %c0_i32_4 : i32
    %7 = arith.extui %6 : i1 to i32
    %c0_i32_5 = arith.constant 0 : i32
    %8 = arith.cmpi ne, %7, %c0_i32_5 : i32
    scf.if %8 {
      %c0_8 = arith.constant 0 : index
      %c0_9 = arith.constant 0 : index
      %12 = vector.load %arg7[%c0_8, %c0_9] : memref<16x128xf32, #tpu.memory_space<vmem>>, vector<16x128xf32>
      %13 = arith.addf %12, %2 : vector<16x128xf32>
      %c0_10 = arith.constant 0 : index
      %c0_11 = arith.constant 0 : index
      %14 = vector.load %arg7[%c0_10, %c0_11] : memref<16x128xf32, #tpu.memory_space<vmem>>, vector<16x128xf32>
      tpu.vector_store %arg7[%c0_10, %c0_11], %13 {strides = array<i32>} : memref<16x128xf32, #tpu.memory_space<vmem>>, vector<16x128xf32>,
    } else {
    }
    %c0_i32_6 = arith.constant 0 : i32
    %9 = arith.cmpi eq, %arg2, %c0_i32_6 : i32
    %10 = arith.extui %9 : i1 to i32
    %c0_i32_7 = arith.constant 0 : i32
    %11 = arith.cmpi ne, %10, %c0_i32_7 : i32
    scf.if %11 {
      %c0_8 = arith.constant 0 : index
      %c0_9 = arith.constant 0 : index
      %12 = vector.load %arg7[%c0_8, %c0_9] : memref<16x128xf32, #tpu.memory_space<vmem>>, vector<16x128xf32>
      %c0_10 = arith.constant 0 : index
      %c0_11 = arith.constant 0 : index
      %13 = vector.load %arg5[%c0_10, %c0_11] : memref<1x128xf32, #tpu.memory_space<vmem>>, vector<1x128xf32>
      %14 = vector.broadcast %13 : vector<1x128xf32> to vector<16x128xf32>
      %15 = arith.addf %12, %14 : vector<16x128xf32>
      %c0_12 = arith.constant 0 : index
      %c0_13 = arith.constant 0 : index
      %16 = vector.load %arg6[%c0_12, %c0_13] : memref<16x128xf32, #tpu.memory_space<vmem>>, vector<16x128xf32>
      tpu.vector_store %arg6[%c0_12, %c0_13], %15 {strides = array<i32>} : memref<16x128xf32, #tpu.memory_space<vmem>>, vector<16x128xf32>,
    } else {
    }
    return
  }
  func.func @transform_0(%arg0: i32, %arg1: i32, %arg2: i32) -> (i32, i32) {
    %c0_i32 = arith.constant 0 : i32
    return %arg0, %arg2 : i32, i32
  }
  func.func @transform_1(%arg0: i32, %arg1: i32, %arg2: i32) -> (i32, i32) {
    %c0_i32 = arith.constant 0 : i32
    return %arg2, %arg1 : i32, i32
  }
  func.func @transform_2(%arg0: i32, %arg1: i32, %arg2: i32) -> (i32, i32) {
    %c0_i32 = arith.constant 0 : i32
    %c0_i32_0 = arith.constant 0 : i32
    return %c0_i32, %arg1 : i32, i32
  }
  func.func @transform_3(%arg0: i32, %arg1: i32, %arg2: i32) -> (i32, i32) {
    %c0_i32 = arith.constant 0 : i32
    return %arg0, %arg1 : i32, i32
  }
}

</mosaic_0001>

<bundles_post_ra>
// kernel: tpu_custom_call.1
= control target key start
LH: loop header
LB: loop body
LE: loop exit
PB: predicated region body
PF: predicated region fallthrough
CT: control target
= control target key end

     0   :  { %8 = vsyncpa [#allocation4], 0  ;;  %s357_s0 = inlined_call_operand.hbm [shape: f32[16,128], index: 0, kind: input, shape index: {}]   ;;  %s358_s1 = inlined_call_operand.hbm [shape: f32[128,128], index: 1, kind: input, shape index: {}]   ;;  %s359_s2 = inlined_call_operand.vmem [shape: f32[1,128], index: 2, kind: input, shape index: {}]   ;;  %s360_s3 = inlined_call_operand.hbm [shape: f32[16,128], index: 3, kind: output, shape index: {}]  }
   0x1   :  { %9 = vsyncpa [#allocation7], 0 }
   0x2   :  { %10 = vsyncpa [#allocation5], 0  ;;  %s311_s12 = smov [#allocation3]  }
   0x3   :  { %s16_s13 = sshll.u32 %s311_s12, 4  ;;  %s17_s13 = int_to_ptr.vmem [resolvable:$true] %s16_s13 }
   0x4   :  { %s253_s14 = scalar_lea.vmem %s17_s13, 256  ;;  %p258_p1 = scmp.lt.s32.totalorder %s17_s13, %s17_s13 }
   0x5   :  { %p254_p0 = scmp.ne.s32.totalorder %s17_s13, %s253_s14  ;;  %p259_p2 = scmp.lt.s32.totalorder %s253_s14, %s253_s14 }
   0x7   :  { %p260_p3 = por %p259_p2, %p258_p1 }
   0x9   :  { %p261_p4 = pnand %p260_p3, %p254_p0 }
   0xb   :  { %264 = shalt.err (!%p261_p4)
}
   0xc   :  { %s312_s15 = smov 128   ;;  %s313_s16 = smov 8  }
   0xd   :  { %22 = dma.hbm_to_vmem [thread:$0]  %s357_s0, 256, %s17_s13, [#allocation4], %s312_s15, %s312_s15, %s313_s16  }
   0xe   :  { %s314_s19 = smov [#allocation6]  }
   0xf   :  { %s28_s20 = sshll.u32 %s314_s19, 4  ;;  %s29_s20 = int_to_ptr.vmem [resolvable:$true] %s28_s20 }
  0x10   :  { %s273_s21 = scalar_lea.vmem %s29_s20, 2048  ;;  %p278_p6 = scmp.lt.s32.totalorder %s29_s20, %s29_s20 }
  0x11   :  { %p274_p5 = scmp.ne.s32.totalorder %s29_s20, %s273_s21  ;;  %p279_p7 = scmp.lt.s32.totalorder %s273_s21, %s273_s21 }
  0x13   :  { %p280_p8 = por %p279_p7, %p278_p6 }
  0x15   :  { %p281_p9 = pnand %p280_p8, %p274_p5 }
  0x17   :  { %284 = shalt.err (!%p281_p9)
}
  0x18   :  { %34 = dma.hbm_to_vmem [thread:$0]  %s358_s1, 2048, %s29_s20, [#allocation7], %s312_s15, %s312_s15, %s313_s16  }
  0x19   :  { %305 = dma.done.wait [#allocation4], 256  }
  0x1a   :  { %306 = vsyncadd [#allocation4], 4294967040 }
  0x1b   :  { %307 = dma.done.wait [#allocation7], 2048  }
  0x1c   :  { %308 = vsyncadd [#allocation7], 4294965248  ;;  %v60_v0 = vld [vmem:[#allocation6 + $0x78] sm:$0xff]  ;;  %v59_v1 = vld [vmem:[#allocation6 + $0x70] sm:$0xff]  ;;  %s315_s24 = smov [#allocation8]  }
  0x1d   :  { %205 = vmatprep.subr.mxu0 %v60_v0  ;;  %v58_v2 = vld [vmem:[#allocation6 + $0x68] sm:$0xff]  ;;  %v57_v3 = vld [vmem:[#allocation6 + $0x60] sm:$0xff]  ;;  %v43_v4 = vld [vmem:[#allocation3] sm:$0xff]  ;;  %s173_s25 = sshll.u32 %s315_s24, 4  ;;  %s174_s25 = int_to_ptr.vmem [resolvable:$true] %s173_s25 }
  0x1e   :  { %206 = vmatpush3.msra.mxu0 %v60_v0  ;;  %v56_v5 = vld [vmem:[#allocation6 + $0x58] sm:$0xff]  ;;  %237 = vmatprep.mubr.f32.mxu0 %v43_v4  ;;  %v55_v6 = vld [vmem:[#allocation6 + $0x50] sm:$0xff]  ;;  %v54_v7 = vld [vmem:[#allocation6 + $0x48] sm:$0xff]  ;;  %s285_s26 = scalar_lea.vmem %s174_s25, 256  ;;  %p290_p11 = scmp.lt.s32.totalorder %s174_s25, %s174_s25 }
  0x1f   :  { %207 = vmatprep.subr.mxu0 %v59_v1  ;;  %v53_v8 = vld [vmem:[#allocation6 + $0x40] sm:$0xff]  ;;  %v52_v9 = vld [vmem:[#allocation6 + $0x38] sm:$0xff]  ;;  %v51_v10 = vld [vmem:[#allocation6 + $0x30] sm:$0xff]  ;;  %p286_p10 = scmp.ne.s32.totalorder %s174_s25, %s285_s26  ;;  %p291_p12 = scmp.lt.s32.totalorder %s285_s26, %s285_s26 }
  0x20   :  { %208 = vmatpush3.msra.mxu0 %v59_v1  ;;  %v50_v11 = vld [vmem:[#allocation6 + $0x28] sm:$0xff]  ;;  %v49_v12 = vld [vmem:[#allocation6 + $0x20] sm:$0xff]  ;;  %v48_v13 = vld [vmem:[#allocation6 + $0x18] sm:$0xff] }
  0x21   :  { %209 = vmatprep.subr.mxu0 %v58_v2  ;;  %v47_v14 = vld [vmem:[#allocation6 + $0x10] sm:$0xff]  ;;  %v46_v15 = vld [vmem:[#allocation6 + $0x8] sm:$0xff]  ;;  %v45_v16 = vld [vmem:[#allocation6] sm:$0xff]  ;;  %p292_p13 = por %p291_p12, %p290_p11 }
  0x22   :  { %210 = vmatpush3.msra.mxu0 %v58_v2  ;;  %v44_v17 = vld [vmem:[#allocation3 + $0x8] sm:$0xff]  ;;  %v186_v18 = vld [vmem:[%s359_s2] ss:$0 sm:$0xff] }
  0x23   :  { %211 = vmatprep.subr.mxu0 %v57_v3  ;;  %p293_p0 = pnand %p292_p13, %p286_p10 }
  0x24   :  { %212 = vmatpush3.msra.mxu0 %v57_v3 }
  0x25   :  { %213 = vmatprep.subr.mxu0 %v56_v5 }
  0x26   :  { %214 = vmatpush3.msra.mxu0 %v56_v5 }
  0x27   :  { %215 = vmatprep.subr.mxu0 %v55_v6 }
  0x28   :  { %216 = vmatpush3.msra.mxu0 %v55_v6 }
  0x29   :  { %217 = vmatprep.subr.mxu0 %v54_v7 }
  0x2a   :  { %218 = vmatpush3.msra.mxu0 %v54_v7 }
  0x2b   :  { %219 = vmatprep.subr.mxu0 %v53_v8 }
  0x2c   :  { %220 = vmatpush3.msra.mxu0 %v53_v8 }
  0x2d   :  { %221 = vmatprep.subr.mxu0 %v52_v9 }
  0x2e   :  { %222 = vmatpush3.msra.mxu0 %v52_v9 }
  0x2f   :  { %223 = vmatprep.subr.mxu0 %v51_v10 }
  0x30   :  { %224 = vmatpush3.msra.mxu0 %v51_v10 }
  0x31   :  { %225 = vmatprep.subr.mxu0 %v50_v11 }
  0x32   :  { %226 = vmatpush3.msra.mxu0 %v50_v11 }
  0x33   :  { %227 = vmatprep.subr.mxu0 %v49_v12 }
  0x34   :  { %228 = vmatpush3.msra.mxu0 %v49_v12 }
  0x35   :  { %229 = vmatprep.subr.mxu0 %v48_v13 }
  0x36   :  { %230 = vmatpush3.msra.mxu0 %v48_v13 }
  0x37   :  { %231 = vmatprep.subr.mxu0 %v47_v14 }
  0x38   :  { %232 = vmatpush3.msra.mxu0 %v47_v14 }
  0x39   :  { %233 = vmatprep.subr.mxu0 %v46_v15 }
  0x3a   :  { %234 = vmatpush3.msra.mxu0 %v46_v15 }
  0x3b   :  { %235 = vmatprep.subr.mxu0 %v45_v16 }
  0x3c   :  { %236 = vmatpush3.msra.mxu0 %v45_v16 }
  0x3d   :  { %238 = vmatmul.mubr.f32.vlgmr.msra.gmra.mxu0 %v44_v17 }
  0xfd   :  { %v239_v19 = vpop.f32.mrf.mxu0 }
  0xfe   :  { %v165_v20 = vadd.f32 %v239_v19, %v186_v18 }
  0xff   :  { %v127_v21 = vpop.f32.mrf.mxu0 }
 0x100   :  { %167 = vst [vmem:[#allocation8 + $0x8] sm:$0xff] %v165_v20  ;;  %v164_v22 = vadd.f32 %v186_v18, %v127_v21 }
 0x102   :  { %166 = vst [vmem:[#allocation8] sm:$0xff] %v164_v22 }
 0x103   :  { %296 = shalt.err (!%p293_p0)
}
 0x104   :  { %179 = dma.vmem_to_hbm [thread:$0]  %s174_s25, 256, %s360_s3, [#allocation5], %s312_s15, %s312_s15, %s313_s16  }
 0x105   :  { %309 = dma.done.wait [#allocation5], 256  }
 0x106   :  { %310 = vsyncadd [#allocation5], 4294967040 }
 0x107   :  { %183 = vsyncpa [#allocation4], 1 }
 0x108   :  { %184 = vsyncpa [#allocation7], 1 }
 0x109   :  { %185 = vsyncpa [#allocation5], 1 }

</bundles_post_ra>
